<compile_context>
chip_gen: v7x
topology: tpu7x:2x2x1
jax: 0.10.0
libtpu: 0.0.40
codegen_flags: <defaults>
</compile_context>

<pallas_src>
import functools

import jax
import jax.numpy as jnp
from jax.experimental import pallas as pl
from jax.experimental.pallas import tpu as pltpu

NUM_CLASSES = 2        # F.one_hot(y_true, 2) in the reference module
EPSILON = 1e-7
LANES = 128
_NUM_CORE_SPLITS = 2   # leading "parallel" grid axis -> both TCs on v7x
_ACC_GROUPS = 32       # interleaved per-lane partial accumulators (chain breaking)
_SENTINEL = 512.0      # pad logit0=+S, logit1=-S  =>  sigmoid(l1-l0) == exactly 0.0


def _round_up(x: int, m: int) -> int:
    return ((x + m - 1) // m) * m


def _f1_partial_kernel(lg_ref, lab_ref, out_ref):
    """One row-block of streaming confusion sums.

    lg_ref : (2, br, 128)  logits planes (plane 0 = class-0 logit, plane 1 = class-1)
    lab_ref: (br, 128)     int8 labels in {0,1} (sentinel pad rows are 0)
    out_ref: (1, 3, G, 128) f32 per-core partial sums, resident across the
             "arbitrary" grid axis: [tp1, sum(p1), count(label==1)] per lane group.
    """
    step = pl.program_id(1)

    l0 = lg_ref[0].astype(jnp.float32)          # (br, 128)
    l1 = lg_ref[1].astype(jnp.float32)          # (br, 128)
    m1 = lab_ref[...].astype(jnp.float32)       # class-1 mask; padding -> 0

    # 2-class softmax prob of class 1 == sigmoid of the logit difference (EUP).
    # Sentinel padding gives l1 - l0 = -1024 -> exactly 0.0, so padded samples
    # contribute nothing to any accumulator (no validity mask needed).
    p1 = jax.nn.sigmoid(l1 - l0)

    br, lanes = m1.shape
    g = _ACC_GROUPS

    def gsum(v):
        # (br, 128) -> (G, 128): G/8 independent vreg accumulation chains instead
        # of a single serial br/8-long vadd chain (protects large tiles on v7x).
        return jnp.sum(v.reshape(br // g, g, lanes), axis=0)

    contrib = jnp.stack([gsum(m1 * p1), gsum(p1), gsum(m1)], axis=0)[None]

    @pl.when(step == 0)
    def _init():
        out_ref[...] = contrib

    @pl.when(step != 0)
    def _accumulate():
        out_ref[...] = out_ref[...] + contrib


@functools.partial(jax.jit, static_argnames=("block_rows",))
def f1_loss(y_pred: jax.Array, y_true: jax.Array, *, block_rows: int = 8192) -> jax.Array:
    """Pallas implementation of F1_Loss.forward.

    Args:
      y_pred: (N, 2) logits (any float dtype; cast to f32 per-tile in-kernel).
      y_true: (N,) integer class labels in {0, 1}.
      block_rows: rows of 128 samples per grid step (rounded up to 32).
    Returns:
      scalar float32 loss = 1 - mean(F1).
    """
    assert y_pred.ndim == 2 and y_pred.shape[1] == NUM_CLASSES
    assert y_true.ndim == 1 and y_true.shape[0] == y_pred.shape[0]
    n = y_pred.shape[0]

    rows_needed = max(1, -(-n // LANES))
    br = min(_round_up(block_rows, _ACC_GROUPS), _round_up(rows_needed, _ACC_GROUPS))
    rows_pad = _round_up(rows_needed, _NUM_CORE_SPLITS * br)
    steps = rows_pad // (_NUM_CORE_SPLITS * br)
    pad = rows_pad * LANES - n

    # ---- layout plumbing (kept to a single fused repack over y_pred) ---------
    yt = y_pred.T                                               # (2, N)
    if pad:
        pad_blk = jnp.concatenate(
            [jnp.full((1, pad), _SENTINEL, dtype=y_pred.dtype),
             jnp.full((1, pad), -_SENTINEL, dtype=y_pred.dtype)], axis=0)
        yt = jnp.concatenate([yt, pad_blk], axis=1)
    planes = yt.reshape(2, rows_pad, LANES)                     # lane-dense planes

    lab = y_true.astype(jnp.int8)                               # 1 B/sample traffic
    if pad:
        lab = jnp.pad(lab, (0, pad))                            # pad value 0
    labels = lab.reshape(rows_pad, LANES)

    n_padded = rows_pad * LANES
    cost = pl.CostEstimate(
        flops=10 * n_padded,
        transcendentals=n_padded,
        bytes_accessed=(planes.size * planes.dtype.itemsize + labels.size
                        + _NUM_CORE_SPLITS * 3 * _ACC_GROUPS * LANES * 4))

    parts = pl.pallas_call(
        _f1_partial_kernel,
        out_shape=jax.ShapeDtypeStruct(
            (_NUM_CORE_SPLITS, 3, _ACC_GROUPS, LANES), jnp.float32),
        grid=(_NUM_CORE_SPLITS, steps),
        in_specs=[
            pl.BlockSpec((2, br, LANES), lambda c, s: (0, c * steps + s, 0)),
            pl.BlockSpec((br, LANES), lambda c, s: (c * steps + s, 0)),
        ],
        out_specs=pl.BlockSpec((1, 3, _ACC_GROUPS, LANES),
                               lambda c, s: (c, 0, 0, 0)),
        compiler_params=pltpu.CompilerParams(
            dimension_semantics=("parallel", "arbitrary"),
            vmem_limit_bytes=32 * 1024 * 1024),
        cost_estimate=cost,
    )(planes, labels)

    # ---- tiny scalar epilogue (fused XLA, runs once) --------------------------
    sums = jnp.sum(parts, axis=(0, 2, 3))          # (3,) = [tp1, sum(p1), n1]
    tp1, p1_sum, n1 = sums[0], sums[1], sums[2]
    n_tot = jnp.float32(n)

    fp1 = p1_sum - tp1
    fn1 = n1 - tp1
    tn1 = (n_tot - n1) - fp1
    # Binary symmetry: class-0 confusion sums are the class-1 ones swapped.
    tp0, fp0, fn0 = tn1, fn1, fp1

    def fbeta(tp, fp, fn):
        precision = tp / (tp + fp + EPSILON)
        recall = tp / (tp + fn + EPSILON)
        f1 = 2.0 * ((1.0 + 0.75 ** 2) * precision * recall) / (
            0.75 ** 2 * precision + recall + EPSILON)
        return jnp.clip(f1, EPSILON, 1.0 - EPSILON)

    return 1.0 - 0.5 * (fbeta(tp0, fp0, fn0) + fbeta(tp1, fp1, fn1))


def _f1_loss_ref(y_pred, y_true, epsilon=EPSILON):
    """Pure-JAX reference mirroring the PyTorch forward exactly."""
    y_true_oh = jax.nn.one_hot(y_true, NUM_CLASSES, dtype=jnp.float32)
    y_prob = jax.nn.softmax(y_pred.astype(jnp.float32), axis=1)
    tp = jnp.sum(y_true_oh * y_prob, axis=0)
    fp = jnp.sum((1 - y_true_oh) * y_prob, axis=0)
    fn = jnp.sum(y_true_oh * (1 - y_prob), axis=0)
    precision = tp / (tp + fp + epsilon)
    recall = tp / (tp + fn + epsilon)
    f1 = 2 * ((1 + 0.75 ** 2) * precision * recall) / (
        0.75 ** 2 * precision + recall + epsilon)
    f1 = jnp.clip(f1, epsilon, 1 - epsilon)
    return 1 - jnp.mean(f1)


if __name__ == "__main__":
    key = jax.random.PRNGKey(0)
    k1, k2, k3, k4, k5, k6 = jax.random.split(key, 6)

    # Small shape consistent with the module: (batch=8, 2) logits, (8,) labels.
    y_pred = jax.random.normal(k1, (8, NUM_CLASSES), dtype=jnp.float32)
    y_true = jax.random.randint(k2, (8,), 0, NUM_CLASSES, dtype=jnp.int32)
    loss = f1_loss(y_pred, y_true)
    jax.block_until_ready(loss)
    ref = _f1_loss_ref(y_pred, y_true)
    assert jnp.allclose(loss, ref, atol=1e-5, rtol=1e-5), (loss, ref)

    # Ragged batch (3000 = 23*128 + 56): exercises exact-zero sentinel padding.
    y_pred2 = jax.random.normal(k3, (3000, NUM_CLASSES), dtype=jnp.float32)
    y_true2 = jax.random.randint(k4, (3000,), 0, NUM_CLASSES, dtype=jnp.int32)
    loss2 = f1_loss(y_pred2, y_true2)
    jax.block_until_ready(loss2)
    ref2 = _f1_loss_ref(y_pred2, y_true2)
    assert jnp.allclose(loss2, ref2, atol=1e-5, rtol=1e-5), (loss2, ref2)

    # Multi-step accumulation path (grid (2, 3)) with bf16 logits and a ragged tail.
    y_pred3 = jax.random.normal(k5, (20000, NUM_CLASSES),
                                dtype=jnp.float32).astype(jnp.bfloat16)
    y_true3 = jax.random.randint(k6, (20000,), 0, NUM_CLASSES, dtype=jnp.int32)
    loss3 = f1_loss(y_pred3, y_true3, block_rows=32)
    jax.block_until_ready(loss3)
    ref3 = _f1_loss_ref(y_pred3, y_true3)
    assert jnp.allclose(loss3, ref3, atol=1e-4, rtol=1e-4), (loss3, ref3)

    print("KERNEL_OK")
</pallas_src>

<mosaic_0001>
module attributes {stable_mosaic.version = 11 : i64} {
  func.func @_f1_partial_kernel(%arg0: i32, %arg1: i32, %arg2: memref<2x32x128xf32, #tpu.memory_space<vmem>>, %arg3: memref<32x128xi8, #tpu.memory_space<vmem>>, %arg4: memref<1x3x32x128xf32, #tpu.memory_space<vmem>>) attributes {dimension_semantics = [#tpu.dimension_semantics<parallel>, #tpu.dimension_semantics<arbitrary>], iteration_bounds = array<i64: 2, 1>, scalar_prefetch = 0 : i64, scratch_operands = 0 : i64, tpu.core_type = #tpu.core_type<tc>, window_params = [{transform_indices = @transform_0, window_bounds = array<i64: 2, 32, 128>}, {transform_indices = @transform_1, window_bounds = array<i64: 32, 128>}, {transform_indices = @transform_2, window_bounds = array<i64: 1, 3, 32, 128>}]} {
    %c0 = arith.constant 0 : index
    %c0_0 = arith.constant 0 : index
    %c0_1 = arith.constant 0 : index
    %0 = vector.load %arg2[%c0, %c0_0, %c0_1] : memref<2x32x128xf32, #tpu.memory_space<vmem>>, vector<1x32x128xf32>
    %1 = vector.shape_cast %0 : vector<1x32x128xf32> to vector<32x128xf32>
    %c1 = arith.constant 1 : index
    %c0_2 = arith.constant 0 : index
    %c0_3 = arith.constant 0 : index
    %2 = vector.load %arg2[%c1, %c0_2, %c0_3] : memref<2x32x128xf32, #tpu.memory_space<vmem>>, vector<1x32x128xf32>
    %3 = vector.shape_cast %2 : vector<1x32x128xf32> to vector<32x128xf32>
    %c0_4 = arith.constant 0 : index
    %c0_5 = arith.constant 0 : index
    %4 = vector.load %arg3[%c0_4, %c0_5] : memref<32x128xi8, #tpu.memory_space<vmem>>, vector<32x128xi8>
    %5 = arith.sitofp %4 : vector<32x128xi8> to vector<32x128xf32>
    %6 = arith.subf %3, %1 : vector<32x128xf32>
    %7 = arith.negf %6 : vector<32x128xf32>
    %8 = math.exp %7 : vector<32x128xf32>
    %cst = arith.constant 1.000000e+00 : f32
    %9 = vector.broadcast %cst : f32 to vector<32x128xf32>
    %10 = arith.addf %9, %8 : vector<32x128xf32>
    %11 = arith.divf %9, %10 : vector<32x128xf32>
    %12 = arith.mulf %5, %11 : vector<32x128xf32>
    %13 = vector.shape_cast %12 : vector<32x128xf32> to vector<1x32x128xf32>
    %cst_6 = arith.constant dense<0.000000e+00> : vector<32x128xf32>
    %14 = vector.multi_reduction <add>, %13, %cst_6 [0] : vector<1x32x128xf32> to vector<32x128xf32>
    %15 = vector.shape_cast %11 : vector<32x128xf32> to vector<1x32x128xf32>
    %cst_7 = arith.constant dense<0.000000e+00> : vector<32x128xf32>
    %16 = vector.multi_reduction <add>, %15, %cst_7 [0] : vector<1x32x128xf32> to vector<32x128xf32>
    %17 = vector.shape_cast %5 : vector<32x128xf32> to vector<1x32x128xf32>
    %cst_8 = arith.constant dense<0.000000e+00> : vector<32x128xf32>
    %18 = vector.multi_reduction <add>, %17, %cst_8 [0] : vector<1x32x128xf32> to vector<32x128xf32>
    %19 = vector.shape_cast %14 : vector<32x128xf32> to vector<1x32x128xf32>
    %20 = vector.shape_cast %16 : vector<32x128xf32> to vector<1x32x128xf32>
    %21 = vector.shape_cast %18 : vector<32x128xf32> to vector<1x32x128xf32>
    %22 = tpu.concatenate %19, %20, %21 in 0 : vector<1x32x128xf32>, vector<1x32x128xf32>, vector<1x32x128xf32> -> vector<3x32x128xf32>
    %23 = vector.shape_cast %22 : vector<3x32x128xf32> to vector<1x3x32x128xf32>
    %c0_i32 = arith.constant 0 : i32
    %24 = arith.cmpi eq, %arg1, %c0_i32 : i32
    %25 = arith.extui %24 : i1 to i32
    %c0_i32_9 = arith.constant 0 : i32
    %26 = arith.cmpi ne, %25, %c0_i32_9 : i32
    scf.if %26 {
      %c0_12 = arith.constant 0 : index
      %c0_13 = arith.constant 0 : index
      %c0_14 = arith.constant 0 : index
      %c0_15 = arith.constant 0 : index
      %30 = vector.load %arg4[%c0_12, %c0_13, %c0_14, %c0_15] : memref<1x3x32x128xf32, #tpu.memory_space<vmem>>, vector<1x3x32x128xf32>
      tpu.vector_store %arg4[%c0_12, %c0_13, %c0_14, %c0_15], %23 {strides = array<i32>} : memref<1x3x32x128xf32, #tpu.memory_space<vmem>>, vector<1x3x32x128xf32>,
    } else {
    }
    %c0_i32_10 = arith.constant 0 : i32
    %27 = arith.cmpi ne, %arg1, %c0_i32_10 : i32
    %28 = arith.extui %27 : i1 to i32
    %c0_i32_11 = arith.constant 0 : i32
    %29 = arith.cmpi ne, %28, %c0_i32_11 : i32
    scf.if %29 {
      %c0_12 = arith.constant 0 : index
      %c0_13 = arith.constant 0 : index
      %c0_14 = arith.constant 0 : index
      %c0_15 = arith.constant 0 : index
      %30 = vector.load %arg4[%c0_12, %c0_13, %c0_14, %c0_15] : memref<1x3x32x128xf32, #tpu.memory_space<vmem>>, vector<1x3x32x128xf32>
      %31 = arith.addf %30, %23 : vector<1x3x32x128xf32>
      %c0_16 = arith.constant 0 : index
      %c0_17 = arith.constant 0 : index
      %c0_18 = arith.constant 0 : index
      %c0_19 = arith.constant 0 : index
      %32 = vector.load %arg4[%c0_16, %c0_17, %c0_18, %c0_19] : memref<1x3x32x128xf32, #tpu.memory_space<vmem>>, vector<1x3x32x128xf32>
      tpu.vector_store %arg4[%c0_16, %c0_17, %c0_18, %c0_19], %31 {strides = array<i32>} : memref<1x3x32x128xf32, #tpu.memory_space<vmem>>, vector<1x3x32x128xf32>,
    } else {
    }
    return
  }
  func.func @transform_0(%arg0: i32, %arg1: i32) -> (i32, i32, i32) {
    %c1_i32 = arith.constant 1 : i32
    %0 = arith.muli %arg0, %c1_i32 : i32
    %1 = arith.addi %0, %arg1 : i32
    %c0_i32 = arith.constant 0 : i32
    %c0_i32_0 = arith.constant 0 : i32
    %c0_i32_1 = arith.constant 0 : i32
    return %c0_i32, %1, %c0_i32_0 : i32, i32, i32
  }
  func.func @transform_1(%arg0: i32, %arg1: i32) -> (i32, i32) {
    %c1_i32 = arith.constant 1 : i32
    %0 = arith.muli %arg0, %c1_i32 : i32
    %1 = arith.addi %0, %arg1 : i32
    %c0_i32 = arith.constant 0 : i32
    %c0_i32_0 = arith.constant 0 : i32
    return %1, %c0_i32 : i32, i32
  }
  func.func @transform_2(%arg0: i32, %arg1: i32) -> (i32, i32, i32, i32) {
    %c0_i32 = arith.constant 0 : i32
    %c0_i32_0 = arith.constant 0 : i32
    %c0_i32_1 = arith.constant 0 : i32
    %c0_i32_2 = arith.constant 0 : i32
    return %arg0, %c0_i32, %c0_i32_0, %c0_i32_1 : i32, i32, i32, i32
  }
}

</mosaic_0001>

<bundles_post_ra>
// kernel: f1_loss.1
= control target key start
LH: loop header
LB: loop body
LE: loop exit
PB: predicated region body
PF: predicated region fallthrough
CT: control target
= control target key end

     0   :  { %s582_s9 = smov 0   ;;  %s584_s10 = smov 0   ;;  %s665_s0 = inlined_call_operand.vmem [shape: f32[2,64,128], index: 0, kind: input, shape index: {}]   ;;  %s666_s1 = inlined_call_operand.vmem [shape: s8[64,128], index: 1, kind: input, shape index: {}]   ;;  %s667_s2 = inlined_call_operand.vmem [shape: f32[2,3,32,128], index: 2, kind: output, shape index: {}]  }
   0x1   :  { %s586_s11 = smov 0   ;;  %s588_s12 = smov 0  }
   0x2   :  { %s590_s13 = smov 0  }
   0x3 LB: > { %s24_s14 = sadd.s32 1, %s561_s12  ;;  %p40_p1 = scmp.ne.s32.totalorder %s553_s10, %s549_s9  ;;  %s565_s13 = sphi %s590_s13, %s12_s13   ;;  %s561_s12 = sphi %s588_s12, %s671_s12   ;;  %s557_s11 = sphi %s586_s11, %s670_s11   ;;  %s553_s10 = sphi %s584_s10, %s669_s10   ;;  %s549_s9 = sphi %s582_s9, %s668_s9  }
   0x4   : > { %p26_p0 = scmp.ge.s32.totalorder %s24_s14, 2  ;;  %p41_p2 = scmp.eq.s32.totalorder %s565_s13, 0 }
   0x5   : > { %s33_s16 = sadd.s32 1, %s553_s10  ;;  %p451_p5 = scmp.ge.s32.totalorder %s565_s13, 2 }
   0x6   : > { %s673_s14 = smov (%p26_p0, %s24_s14), 0  ;;  %p42_p3 = por %p41_p2, %p40_p1 }
   0x7   : > { %s30_s15 = ssub.s32 %s561_s12, %s673_s14  ;;  %120 = sbr.rel (%p451_p5) target bundleno = 22 (0x16), region = 16 }
   0x8   : > { %p31_p4 = scmp.eq.s32.totalorder %s30_s15, 0 }
   0xa   : > { %s617_s17 = scalar_select %p31_p4, %s553_s10, %s33_s16  }
   0xe   : > { %123 = sbr.rel (!%p42_p3) target bundleno = 22 (0x16), region = 20  ;;  %s125_s18 = sand.u32 (%p42_p3), 1, %s553_s10  }
   0xf   : > { %s469_s19 = sshll.u32 (%p42_p3), %s561_s12, 5  ;;  %s452_s20 = sshll.u32 (%p42_p3), %s125_s18, 6 }
  0x10   : > { %s131_s23 = scalar_lea.vmem (%p42_p3), %s665_s0, %s469_s19  ;;  %s127_s24 = scalar_lea.vmem (%p42_p3), [#allocation2], %s452_s20 }
  0x11   : > { %v173_v0 = vld [vmem:[%s131_s23] sm:$0xff] (%p42_p3)  ;;  %v175_v1 = vld [vmem:[%s131_s23 + $0x8] sm:$0xff] (%p42_p3)  ;;  %v177_v2 = vld [vmem:[%s131_s23 + $0x10] sm:$0xff] (%p42_p3) }
  0x12   : > { %174 = vst [vmem:[%s127_s24] sm:$0xff] (%p42_p3), %v173_v0  ;;  %176 = vst [vmem:[%s127_s24 + $0x8] sm:$0xff] (%p42_p3), %v175_v1  ;;  %v179_v3 = vld [vmem:[%s131_s23 + $0x18] sm:$0xff] (%p42_p3)  ;;  %v181_v4 = vld [vmem:[%s131_s23 + $0x40] sm:$0xff] (%p42_p3) }
  0x13   : > { %178 = vst [vmem:[%s127_s24 + $0x10] sm:$0xff] (%p42_p3), %v177_v2  ;;  %v183_v5 = vld [vmem:[%s131_s23 + $0x48] sm:$0xff] (%p42_p3)  ;;  %180 = vst [vmem:[%s127_s24 + $0x18] sm:$0xff] (%p42_p3), %v179_v3  ;;  %v185_v6 = vld [vmem:[%s131_s23 + $0x50] sm:$0xff] (%p42_p3) }
  0x14   : > { %182 = vst [vmem:[%s127_s24 + $0x20] sm:$0xff] (%p42_p3), %v181_v4  ;;  %184 = vst [vmem:[%s127_s24 + $0x28] sm:$0xff] (%p42_p3), %v183_v5  ;;  %v187_v7 = vld [vmem:[%s131_s23 + $0x58] sm:$0xff] (%p42_p3) }
  0x15   : > { %186 = vst [vmem:[%s127_s24 + $0x30] sm:$0xff] %v185_v6  ;;  %188 = vst [vmem:[%s127_s24 + $0x38] sm:$0xff] %v187_v7 }
  0x16 PF: > { %p455_p6 = scmp.ge.s32.totalorder %s565_s13, 1  ;;  %p202_p7 = scmp.lt.s32.totalorder %s565_s13, 3 }
  0x18   : > { %p203_p8 = pnand %p455_p6, %p202_p7 }
  0x19   : > { %s209_s25 = sand.u32 (!%p203_p8), 1, %s549_s9   ;;  %p238_p9 = scmp.lt.s32.totalorder (!%p203_p8), %s557_s11, 1 }
  0x1a   : > { %206 = sbr.rel (%p203_p8) target bundleno = 65 (0x41), region = 62  ;;  %s456_s26 = sshll.u32 (!%p203_p8), %s209_s25, 6 }
  0x1b   : > { %s211_s27 = scalar_lea.vmem (!%p203_p8), [#allocation2], %s456_s26 }
  0x1c   : > { %v248_v8 = vld [vmem:[%s211_s27] sm:$0xff] (!%p203_p8)  ;;  %v249_v10 = vld [vmem:[%s211_s27 + $0x8] sm:$0xff] (!%p203_p8)  ;;  %v250_v13 = vld [vmem:[%s211_s27 + $0x10] sm:$0xff] (!%p203_p8) }
  0x1d   : > { %v459_v9 = vld [vmem:[%s211_s27 + $0x20] sm:$0xff] (!%p203_p8)  ;;  %v460_v12 = vld [vmem:[%s211_s27 + $0x28] sm:$0xff] (!%p203_p8)  ;;  %v461_v14 = vld [vmem:[%s211_s27 + $0x30] sm:$0xff] (!%p203_p8) }
  0x1e   : > { %v266_v11 = vsub.f32 (!%p203_p8), %v459_v9, %v248_v8  ;;  %v267_v15 = vsub.f32 (!%p203_p8), %v460_v12, %v249_v10  ;;  %v268_v16 = vsub.f32 (!%p203_p8), %v461_v14, %v250_v13  ;;  %v251_v17 = vld [vmem:[%s211_s27 + $0x18] sm:$0xff] (!%p203_p8) }
  0x1f   : > { %v462_v18 = vld [vmem:[%s211_s27 + $0x38] sm:$0xff] (!%p203_p8) }
  0x20   : > { %v463_v19 = vmul.f32 (!%p203_p8), -1.442695, %v266_v11  ;;  %v269_v20 = vsub.f32 (!%p203_p8), %v462_v18, %v251_v17  ;;  %v464_v22 = vmul.f32 (!%p203_p8), -1.442695, %v267_v15  ;;  %v465_v23 = vmul.f32 (!%p203_p8), -1.442695, %v268_v16 }
  0x21   : > { %s675_s11 = smov (!%p238_p9, %s557_s11), 1 }
  0x22   : > { %s457_s28 = sshll.u32 %s675_s11, 3  ;;  %s470_s29 = smul.u32 96, %s675_s11  ;;  %511 = vpow2.f32 %v463_v19  ;;  %v466_v28 = vmul.f32 -1.442695, %v269_v20 }
  0x23   : > { %s241_s4 = scalar_lea.vmem %s666_s1, %s457_s28  ;;  %513 = vpow2.f32 %v464_v22 }
  0x24   : > { %v257_v21 = vld [vmem:[%s241_s4] sm:$0xff]  ;;  %s636_s7 = scalar_lea.vmem %s667_s2, %s470_s29  ;;  %515 = vpow2.f32 %v465_v23 }
  0x25   : > { %v258_v24 = vunpack.c.0.s8 %v257_v21  ;;  %v259_v25 = vunpack.c.1.s8 %v257_v21  ;;  %v260_v26 = vunpack.c.2.s8 %v257_v21  ;;  %v261_v27 = vunpack.c.3.s8 %v257_v21 }
  0x26   : > { %517 = vpow2.f32 %v466_v28 }
  0x27   : > { %v262_v29 = vcvt.s32.f32 %v258_v24  ;;  %v263_v30 = vcvt.s32.f32 %v259_v25  ;;  %v264_v31 = vcvt.s32.f32 %v260_v26  ;;  %v265_v32 = vcvt.s32.f32 %v261_v27 }
  0x29   : > { %322 = vst [vmem:[%s636_s7 + $0x40] sm:$0xff] %v262_v29  ;;  %323 = vst [vmem:[%s636_s7 + $0x48] sm:$0xff] %v263_v30 }
  0x2a   : > { %324 = vst [vmem:[%s636_s7 + $0x50] sm:$0xff] %v264_v31  ;;  %325 = vst [vmem:[%s636_s7 + $0x58] sm:$0xff] %v265_v32 }
  0x2c   : > { %v512_v33 = vpop.eup %511 }
  0x2d   : > { %v514_v34 = vpop.eup %513  ;;  %v282_v35 = vadd.f32 1.0, %v512_v33 }
  0x2e   : > { %v516_v36 = vpop.eup %515  ;;  %v283_v37 = vadd.f32 1.0, %v514_v34 }
  0x2f   : > { %519 = vrcp.f32 %v282_v35  ;;  %v284_v39 = vadd.f32 1.0, %v516_v36 }
  0x30   : > { %v518_v38 = vpop.eup %517  ;;  %521 = vrcp.f32 %v283_v37 }
  0x31   : > { %v285_v40 = vadd.f32 1.0, %v518_v38  ;;  %523 = vrcp.f32 %v284_v39 }
  0x33   : > { %525 = vrcp.f32 %v285_v40 }
  0x39   : > { %v520_v41 = vpop.eup %519 }
  0x3a   : > { %v522_v42 = vpop.eup %521  ;;  %v294_v43 = vmul.f32 %v520_v41, %v262_v29  ;;  %318 = vst [vmem:[%s636_s7 + $0x20] sm:$0xff] %v520_v41 }
  0x3b   : > { %v524_v44 = vpop.eup %523  ;;  %v295_v45 = vmul.f32 %v522_v42, %v263_v30  ;;  %319 = vst [vmem:[%s636_s7 + $0x28] sm:$0xff] %v522_v42 }
  0x3c   : > { %314 = vst [vmem:[%s636_s7] sm:$0xff] %v294_v43  ;;  %v296_v47 = vmul.f32 %v524_v44, %v264_v31  ;;  %320 = vst [vmem:[%s636_s7 + $0x30] sm:$0xff] %v524_v44 }
  0x3d   : > { %v526_v46 = vpop.eup %525  ;;  %315 = vst [vmem:[%s636_s7 + $0x8] sm:$0xff] %v295_v45 }
  0x3e   : > { %v297_v48 = vmul.f32 %v526_v46, %v265_v32  ;;  %321 = vst [vmem:[%s636_s7 + $0x38] sm:$0xff] %v526_v46  ;;  %316 = vst [vmem:[%s636_s7 + $0x10] sm:$0xff] %v296_v47 }
  0x40   : > { %317 = vst [vmem:[%s636_s7 + $0x18] sm:$0xff] %v297_v48 }
  0x41 PF: > { %s12_s13 = sadd.s32 1, %s565_s13   ;;  %s668_s9 = smov %s553_s10 }
  0x42   : > { %p9_p10 = scmp.ge.s32.totalorder %s12_s13, 4   ;;  %s669_s10 = smov %s617_s17 }
  0x43   : > { %s670_s11 = smov %s561_s12  ;;  %s671_s12 = smov %s673_s14 }
  0x44   :  { %11 = sbr.rel (!%p9_p10) target bundleno = 3 (0x3), region = 113 }

</bundles_post_ra>
